<compile_context>
chip_gen: v5e
topology: v5e:2x2
jax: 0.10.0
libtpu: 0.0.40
codegen_flags: <defaults>
</compile_context>

<pallas_src>
import jax
import jax.numpy as jnp
from jax.experimental import pallas as pl
from jax.experimental.pallas import tpu as pltpu

LAYER_SIZES = [2, 2]
_LANE = 128
_MAX_TILE_B = 8192  # lanes per grid step; 2*8192*4B*2buf per array -> well under VMEM


def _linear_kernel(w_ref, b_ref, x_ref, o_ref):
    # w_ref: SMEM (2, 2), PyTorch (out_features, in_features) layout.
    # b_ref: SMEM (2,)
    # x_ref: VMEM (2, TILE_B) feature-major input tile (lane-dense).
    # o_ref: VMEM (2, TILE_B) feature-major output tile.
    x0 = x_ref[pl.ds(0, 1), :]  # (1, TILE_B)
    x1 = x_ref[pl.ds(1, 1), :]  # (1, TILE_B)
    # Pure VPU: scalar (SMEM) * vreg broadcast mul/add, no MXU push/pop.
    o_ref[pl.ds(0, 1), :] = w_ref[0, 0] * x0 + w_ref[0, 1] * x1 + b_ref[0]
    o_ref[pl.ds(1, 1), :] = w_ref[1, 0] * x0 + w_ref[1, 1] * x1 + b_ref[1]


def net_forward(x, weight, bias, *, tile_b=None):
    """Forward pass of Net: y = x @ weight.T + bias.

    x:      (B, 2) float32
    weight: (2, 2) float32 (PyTorch nn.Linear convention: (out, in))
    bias:   (2,)   float32
    """
    B, in_f = x.shape
    out_f, w_in = weight.shape
    assert in_f == 2 and out_f == 2 and w_in == 2, "Net is Linear(2, 2)"

    # Feature-major, lane-dense layout: last dim = batch.
    xt = x.T  # (2, B)

    # Pick a lane-dense tile: multiple of 128, capped at _MAX_TILE_B.
    lane_b = pl.cdiv(B, _LANE) * _LANE
    if tile_b is None:
        tile_b = min(lane_b, _MAX_TILE_B)
    b_pad = pl.cdiv(B, tile_b) * tile_b
    if b_pad != B:
        xt = jnp.pad(xt, ((0, 0), (0, b_pad - B)))

    grid = (b_pad // tile_b,)

    out_t = pl.pallas_call(
        _linear_kernel,
        out_shape=jax.ShapeDtypeStruct((2, b_pad), x.dtype),
        grid=grid,
        in_specs=[
            # Weights / bias: tiny, scalar-indexed -> SMEM, no VMEM tiles.
            pl.BlockSpec(memory_space=pltpu.MemorySpace.SMEM),
            pl.BlockSpec(memory_space=pltpu.MemorySpace.SMEM),
            # Activations: (2, TILE_B) lane-dense blocks streamed over the batch.
            pl.BlockSpec((2, tile_b), lambda i: (0, i)),
        ],
        out_specs=pl.BlockSpec((2, tile_b), lambda i: (0, i)),
        compiler_params=pltpu.CompilerParams(
            dimension_semantics=("parallel",),
        ),
    )(weight, bias, xt)

    # Back to PyTorch layout (B, 2), dropping the batch padding.
    return out_t[:, :B].T


def init_params(key, layer_sizes):
    """Deterministic init matching nn.Linear's default U(-1/sqrt(in), 1/sqrt(in))."""
    in_f, out_f = layer_sizes[0], layer_sizes[1]
    k_w, k_b = jax.random.split(key)
    bound = 1.0 / jnp.sqrt(jnp.float32(in_f))
    weight = jax.random.uniform(k_w, (out_f, in_f), jnp.float32, -bound, bound)
    bias = jax.random.uniform(k_b, (out_f,), jnp.float32, -bound, bound)
    return weight, bias


if __name__ == "__main__":
    key = jax.random.PRNGKey(0)
    k_x, k_x2, k_p = jax.random.split(key, 3)

    weight, bias = init_params(k_p, LAYER_SIZES)

    # Small case consistent with the module (single grid step, padded lanes).
    batch = 8
    x = jax.random.normal(k_x, (batch, LAYER_SIZES[0]), jnp.float32)
    y = net_forward(x, weight, bias)
    jax.block_until_ready(y)
    y_ref = x @ weight.T + bias
    assert y.shape == (batch, LAYER_SIZES[1])
    assert jnp.allclose(y, y_ref, atol=1e-5, rtol=1e-5)

    # Second case exercising the tiled grid path (grid > 1) + batch padding.
    batch2 = 2500
    x2 = jax.random.normal(k_x2, (batch2, LAYER_SIZES[0]), jnp.float32)
    y2 = net_forward(x2, weight, bias, tile_b=1024)
    jax.block_until_ready(y2)
    y2_ref = x2 @ weight.T + bias
    assert y2.shape == (batch2, LAYER_SIZES[1])
    assert jnp.allclose(y2, y2_ref, atol=1e-5, rtol=1e-5)

    print("KERNEL_OK")
</pallas_src>

<mosaic_0001>
module attributes {stable_mosaic.version = 11 : i64} {
  func.func @_linear_kernel(%arg0: i32, %arg1: memref<2x2xf32, #tpu.memory_space<smem>>, %arg2: memref<2xf32, #tpu.memory_space<smem>>, %arg3: memref<2x128xf32, #tpu.memory_space<vmem>>, %arg4: memref<2x128xf32, #tpu.memory_space<vmem>>) attributes {dimension_semantics = [#tpu.dimension_semantics<parallel>], iteration_bounds = array<i64: 1>, scalar_prefetch = 0 : i64, scratch_operands = 0 : i64, tpu.core_type = #tpu.core_type<tc>, window_params = [{transform_indices = @transform_0, window_bounds = array<i64: 2, 2>}, {transform_indices = @transform_1, window_bounds = array<i64: 2>}, {transform_indices = @transform_2, window_bounds = array<i64: 2, 128>}, {transform_indices = @transform_3, window_bounds = array<i64: 2, 128>}]} {
    %c0 = arith.constant 0 : index
    %c0_0 = arith.constant 0 : index
    %0 = vector.load %arg3[%c0, %c0_0] : memref<2x128xf32, #tpu.memory_space<vmem>>, vector<1x128xf32>
    %c1 = arith.constant 1 : index
    %c0_1 = arith.constant 0 : index
    %1 = vector.load %arg3[%c1, %c0_1] : memref<2x128xf32, #tpu.memory_space<vmem>>, vector<1x128xf32>
    %c0_2 = arith.constant 0 : index
    %c0_3 = arith.constant 0 : index
    %2 = memref.load %arg1[%c0_2, %c0_3] : memref<2x2xf32, #tpu.memory_space<smem>>
    %3 = vector.broadcast %2 : f32 to vector<1x128xf32>
    %4 = arith.mulf %3, %0 : vector<1x128xf32>
    %c0_4 = arith.constant 0 : index
    %c1_5 = arith.constant 1 : index
    %5 = memref.load %arg1[%c0_4, %c1_5] : memref<2x2xf32, #tpu.memory_space<smem>>
    %6 = vector.broadcast %5 : f32 to vector<1x128xf32>
    %7 = arith.mulf %6, %1 : vector<1x128xf32>
    %8 = arith.addf %4, %7 : vector<1x128xf32>
    %c0_6 = arith.constant 0 : index
    %9 = memref.load %arg2[%c0_6] : memref<2xf32, #tpu.memory_space<smem>>
    %10 = vector.broadcast %9 : f32 to vector<1x128xf32>
    %11 = arith.addf %8, %10 : vector<1x128xf32>
    %c0_7 = arith.constant 0 : index
    %c0_8 = arith.constant 0 : index
    %12 = vector.load %arg4[%c0_7, %c0_8] : memref<2x128xf32, #tpu.memory_space<vmem>>, vector<1x128xf32>
    tpu.vector_store %arg4[%c0_7, %c0_8], %11 {strides = array<i32>} : memref<2x128xf32, #tpu.memory_space<vmem>>, vector<1x128xf32>,
    %c1_9 = arith.constant 1 : index
    %c0_10 = arith.constant 0 : index
    %13 = memref.load %arg1[%c1_9, %c0_10] : memref<2x2xf32, #tpu.memory_space<smem>>
    %14 = vector.broadcast %13 : f32 to vector<1x128xf32>
    %15 = arith.mulf %14, %0 : vector<1x128xf32>
    %c1_11 = arith.constant 1 : index
    %c1_12 = arith.constant 1 : index
    %16 = memref.load %arg1[%c1_11, %c1_12] : memref<2x2xf32, #tpu.memory_space<smem>>
    %17 = vector.broadcast %16 : f32 to vector<1x128xf32>
    %18 = arith.mulf %17, %1 : vector<1x128xf32>
    %19 = arith.addf %15, %18 : vector<1x128xf32>
    %c1_13 = arith.constant 1 : index
    %20 = memref.load %arg2[%c1_13] : memref<2xf32, #tpu.memory_space<smem>>
    %21 = vector.broadcast %20 : f32 to vector<1x128xf32>
    %22 = arith.addf %19, %21 : vector<1x128xf32>
    %c1_14 = arith.constant 1 : index
    %c0_15 = arith.constant 0 : index
    %23 = vector.load %arg4[%c1_14, %c0_15] : memref<2x128xf32, #tpu.memory_space<vmem>>, vector<1x128xf32>
    tpu.vector_store %arg4[%c1_14, %c0_15], %22 {strides = array<i32>} : memref<2x128xf32, #tpu.memory_space<vmem>>, vector<1x128xf32>,
    return
  }
  func.func @transform_0(%arg0: i32) -> (i32, i32) {
    %c0_i32 = arith.constant 0 : i32
    %c0_i32_0 = arith.constant 0 : i32
    %c0_i32_1 = arith.constant 0 : i32
    return %c0_i32, %c0_i32_0 : i32, i32
  }
  func.func @transform_1(%arg0: i32) -> i32 {
    %c0_i32 = arith.constant 0 : i32
    %c0_i32_0 = arith.constant 0 : i32
    return %c0_i32 : i32
  }
  func.func @transform_2(%arg0: i32) -> (i32, i32) {
    %c0_i32 = arith.constant 0 : i32
    %c0_i32_0 = arith.constant 0 : i32
    return %c0_i32, %arg0 : i32, i32
  }
  func.func @transform_3(%arg0: i32) -> (i32, i32) {
    %c0_i32 = arith.constant 0 : i32
    %c0_i32_0 = arith.constant 0 : i32
    return %c0_i32, %arg0 : i32, i32
  }
}

</mosaic_0001>

<bundles_post_ra>
// kernel: tpu_custom_call.1
= control target key start
LH: loop header
LB: loop body
LE: loop exit
PB: predicated region body
PF: predicated region fallthrough
CT: control target
= control target key end

     0   :  { %8 = vsyncpa [#allocation5], 0  ;;  %s221_s0 = inlined_call_operand.hbm [shape: f32[2,2], index: 0, kind: input, shape index: {}]   ;;  %s222_s1 = inlined_call_operand.hbm [shape: f32[2], index: 1, kind: input, shape index: {}]   ;;  %s223_s2 = inlined_call_operand.hbm [shape: f32[2,128], index: 2, kind: input, shape index: {}]   ;;  %s224_s3 = inlined_call_operand.hbm [shape: f32[2,128], index: 3, kind: output, shape index: {}]  }
   0x1   :  { %9 = vsyncpa [#allocation7], 0 }
   0x2   :  { %10 = vsyncpa [#allocation3], 0 }
   0x3   :  { %11 = vsyncpa [#allocation4], 0  ;;  %s17_s14 = sshll.u32 %s221_s0, 4  ;;  %s26_s17 = sshll.u32 %s222_s1, 4  ;;  %s18_s14 = int_to_ptr.hbm [resolvable:$true] %s17_s14  ;;  %s27_s17 = int_to_ptr.hbm [resolvable:$true] %s26_s17 }
   0x4   :  { %s185_s18 = smov [#allocation2]   ;;  %s186_s19 = smov [#allocation6]  }
   0x5   :  { %20 = dma.hbm_to_smem %s18_s14, 32, %s185_s18, [#allocation5]  }
   0x6   :  { %29 = dma.hbm_to_smem %s27_s17, 16, %s186_s19, [#allocation7]  }
   0x7   :  { %s35_s22 = sshll.u32 %s223_s2, 4  ;;  %s187_s23 = smov [#allocation8]   ;;  %s36_s22 = int_to_ptr.hbm [resolvable:$true] %s35_s22 }
   0x8   :  { %s37_s24 = sshll.u32 %s187_s23, 4  ;;  %s38_s24 = int_to_ptr.vmem [resolvable:$true] %s37_s24 }
   0x9   :  { %40 = dma.hbm_to_vmem [thread:$0]  %s36_s22, 32, %s38_s24, [#allocation3]  }
   0xa   :  { %177 = dma.done.wait [#allocation5], 32  }
   0xb   :  { %178 = vsyncadd [#allocation5], 4294967264 }
   0xc   :  { %179 = dma.done.wait [#allocation7], 16  }
   0xd   :  { %180 = vsyncadd [#allocation7], 4294967280 }
   0xe   :  { %181 = dma.done.wait [#allocation3], 32  }
   0xf   :  { %182 = vsyncadd [#allocation3], 4294967264 }
  0x10   :  { %53 = sfence }
  0x11   :  { %s56_s0 = sld [smem:[#allocation2]]  ;;  %v54_v0 = vld [vmem:[#allocation8] sm:$0x1]  ;;  %v55_v1 = vld [vmem:[#allocation8 + $0x1] sm:$0x1]  ;;  %s188_s28 = smov [#allocation9]  }
  0x12   :  { %s97_s1 = sld [smem:[#allocation2 + $0x1]]  ;;  %s83_s29 = sshll.u32 %s188_s28, 4  ;;  %s84_s29 = int_to_ptr.vmem [resolvable:$true] %s83_s29 }
  0x13   :  { %s63_s25 = sld [smem:[#allocation6]]  ;;  %s85_s5 = sshll.u32 %s224_s3, 4  ;;  %s86_s5 = int_to_ptr.hbm [resolvable:$true] %s85_s5 }
  0x14   :  { %s98_s26 = sld [smem:[#allocation2 + $0x80]] }
  0x15   :  { %s99_s27 = sld [smem:[#allocation2 + $0x81]] }
  0x16   :  { %s100_s2 = sld [smem:[#allocation6 + $0x1]] }
  0x17   :  { %v57_v2 = vstv %s56_s0 }
  0x18   :  { %v58_v3 = vmul.f32 %v57_v2, %v54_v0  ;;  %v60_v4 = vstv %s97_s1 }
  0x19   :  { %v61_v5 = vmul.f32 %v60_v4, %v55_v1  ;;  %v64_v6 = vstv %s63_s25 }
  0x1a   :  { %v68_v7 = vstv %s98_s26 }
  0x1b   :  { %v62_v8 = vadd.f32 %v61_v5, %v58_v3  ;;  %v69_v9 = vmul.f32 %v68_v7, %v54_v0  ;;  %v71_v10 = vstv %s99_s27 }
  0x1c   :  { %v72_v11 = vmul.f32 %v71_v10, %v55_v1  ;;  %v75_v13 = vstv %s100_s2 }
  0x1d   :  { %v65_v12 = vadd.f32 %v64_v6, %v62_v8 }
  0x1e   :  { %v73_v14 = vadd.f32 %v72_v11, %v69_v9 }
  0x1f   :  { %66 = vst [vmem:[#allocation9] sm:$0x1] %v65_v12 }
  0x20   :  { %v76_v15 = vadd.f32 %v75_v13, %v73_v14 }
  0x22   :  { %77 = vst [vmem:[#allocation9 + $0x1] sm:$0x1] %v76_v15 }
  0x23   :  { %88 = dma.vmem_to_hbm [thread:$0]  %s84_s29, 32, %s86_s5, [#allocation4]  }
  0x24   :  { %183 = dma.done.wait [#allocation4], 32  }
  0x25   :  { %184 = vsyncadd [#allocation4], 4294967264 }
  0x26   :  { %93 = vsyncpa [#allocation3], 1 }
  0x27   :  { %94 = vsyncpa [#allocation4], 1 }
  0x28   :  { %95 = vsyncpa [#allocation5], 1 }
  0x29   :  { %96 = vsyncpa [#allocation7], 1 }

</bundles_post_ra>
